<compile_context>
chip_gen: v6e
topology: v6e:2x2x1
jax: 0.10.0
libtpu: 0.0.40
codegen_flags: <defaults>
</compile_context>

<pallas_src>
import functools

import jax
import jax.numpy as jnp
import numpy as np
from jax import lax
from jax.experimental import pallas as pl
from jax.experimental.pallas import tpu as pltpu


def _round_up(x, m):
    return ((x + m - 1) // m) * m


# -----------------------------------------------------------------------------
# Fused Pallas kernel: streaming mean-pool over seq -> dense + tanh -> out_proj
# -----------------------------------------------------------------------------
def _cls_head_kernel(h_ref, dw_ref, db_ref, ow_ref, ob_ref, o_ref, acc_ref,
                     *, inv_s, seq_len, ts, mask_seq):
    # h_ref:  (TB, TS, D)  hidden-state tile in its native dtype (bf16/f32)
    # dw_ref: (D, D)       dense weight, bf16, (in, out)
    # db_ref: (1, D)       dense bias, f32
    # ow_ref: (D, LP)      out_proj weight, bf16, lane-padded to LP (>=128)
    # ob_ref: (1, LP)      out_proj bias, f32, lane-padded
    # o_ref:  (TB, LP)     logits tile (lane-dense output)
    # acc_ref:(TB, D)      f32 running sum over the sequence axis
    s = pl.program_id(1)

    @pl.when(s == 0)
    def _():
        acc_ref[...] = jnp.zeros_like(acc_ref)

    h = h_ref[...].astype(jnp.float32)                      # accumulate in f32
    if mask_seq:
        # Last seq tile is partial: block padding is undefined, mask it out.
        d = h.shape[-1]
        seq_idx = s * ts + lax.broadcasted_iota(jnp.int32, (ts, d), 0)
        h = jnp.where((seq_idx < seq_len)[None, :, :], h, 0.0)

    # Cross-sublane reduce over seq; kernel is DMA-bound so this hides under the
    # HBM stream (re-check the bundle dump if the saturated slot ever flips).
    acc_ref[...] += jnp.sum(h, axis=1)

    @pl.when(s == pl.num_programs(1) - 1)
    def _():
        pooled = acc_ref[...] * inv_s                       # (TB, D) f32 mean
        # dense + tanh (bf16 operands, f32 accumulation)
        x = jnp.dot(pooled.astype(jnp.bfloat16), dw_ref[...],
                    preferred_element_type=jnp.float32) + db_ref[...]
        x = jnp.tanh(x)
        # out_proj (lane-padded to LP columns -> unmasked, lane-dense stores)
        logits = jnp.dot(x.astype(jnp.bfloat16), ow_ref[...],
                         preferred_element_type=jnp.float32) + ob_ref[...]
        o_ref[...] = logits.astype(o_ref.dtype)


def classification_head_pallas(hidden_states, dense_w, dense_b, out_w, out_b,
                               *, tile_bytes=8 * 1024 * 1024):
    """hidden_states: [B, S, D] (native dtype, streamed as-is) -> logits [B, L]."""
    B, S, D = hidden_states.shape
    L = out_w.shape[1]
    LP = max(128, _round_up(L, 128))              # lane-dense output width

    # --- batch tile: guarantee >=2 tiles when B is big enough so the "parallel"
    #     batch axis can shard across both v7x TensorCores (no effect v5e/v6e).
    if B >= 16:
        TB = min(128, _round_up((B + 1) // 2, 8))
    else:
        TB = B

    # --- seq tile: round DOWN into the ~tile_bytes budget; multiple of 8
    #     (or == S when S < 8). Tail tile handled by in-kernel masking.
    itemsize = jnp.dtype(hidden_states.dtype).itemsize
    ts_budget = max(8, tile_bytes // max(1, TB * D * itemsize))
    TS = max(8, (ts_budget // 8) * 8)
    if S < 8:
        TS = S
    elif S % 8 == 0:
        TS = min(TS, S)
    else:
        TS = min(TS, (S // 8) * 8)
    mask_seq = (S % TS) != 0

    grid = (pl.cdiv(B, TB), pl.cdiv(S, TS))

    # Weights/biases pre-cast once; constant index_maps keep them VMEM-resident.
    dw = dense_w.astype(jnp.bfloat16)                                   # (D, D)
    db = dense_b.reshape(1, D).astype(jnp.float32)                      # (1, D)
    ow = jnp.pad(out_w.astype(jnp.bfloat16), ((0, 0), (0, LP - L)))     # (D, LP)
    ob = jnp.pad(out_b.astype(jnp.float32), (0, LP - L)).reshape(1, LP)  # (1, LP)

    # Explicit scoped-VMEM limit: 2x hidden tile + resident weights + scratch,
    # with headroom; clamped so it is safe on v5e/v6e (128 MiB) and v7x (64 MiB).
    hid_tile_bytes = TB * TS * D * itemsize
    const_bytes = (D * D + D * LP) * 2 + (D + LP) * 4
    scratch_bytes = TB * D * 4 + 2 * TB * LP * 4
    vmem_need = 2 * hid_tile_bytes + 2 * const_bytes + scratch_bytes
    vmem_limit = int(min(max(int(vmem_need * 1.25) + (2 << 20), 32 << 20), 64 << 20))

    kernel = functools.partial(_cls_head_kernel, inv_s=1.0 / S,
                               seq_len=S, ts=TS, mask_seq=mask_seq)

    def _run(single_buffer_weights):
        def const_spec(shape):
            if single_buffer_weights:
                # Constant block index across the whole grid -> one buffer is enough.
                return pl.BlockSpec(shape, lambda b, s: (0, 0),
                                    pipeline_mode=pl.Buffered(1))
            return pl.BlockSpec(shape, lambda b, s: (0, 0))

        return pl.pallas_call(
            kernel,
            out_shape=jax.ShapeDtypeStruct((B, LP), jnp.float32),
            grid=grid,
            in_specs=[
                # hidden: streamed tile-by-tile over (batch, seq), native dtype
                pl.BlockSpec((TB, TS, D), lambda b, s: (b, s, 0)),
                const_spec((D, D)),
                const_spec((1, D)),
                const_spec((D, LP)),
                const_spec((1, LP)),
            ],
            # output block constant across the seq axis -> written only in finalize
            out_specs=pl.BlockSpec((TB, LP), lambda b, s: (b, 0)),
            scratch_shapes=[pltpu.VMEM((TB, D), jnp.float32)],
            compiler_params=pltpu.CompilerParams(
                dimension_semantics=("parallel", "arbitrary"),
                vmem_limit_bytes=vmem_limit,
            ),
        )(hidden_states, dw, db, ow, ob)

    use_single = hasattr(pl, "Buffered")
    try:
        logits_padded = _run(use_single)
    except Exception:
        if not use_single:
            raise
        # TODO(synk): pipeline_mode=pl.Buffered(1) unsupported on this JAX build;
        #             fall back to default double-buffered weight specs.
        logits_padded = _run(False)

    return logits_padded[:, :L]


# -----------------------------------------------------------------------------
# Model wrapper (glue in plain JAX)
# -----------------------------------------------------------------------------
class SwitchClassifierMultircPallas:
    def __init__(self, num_labels, d_model, vocab_size, key):
        self.num_labels = num_labels
        self.d_model = d_model
        k_emb, k_dw, k_db, k_ow, k_ob = jax.random.split(key, 5)
        scale = 1.0 / np.sqrt(d_model)
        # Encoder stub parameters (stand-in for the pretrained MoE encoder).
        # bf16 so the [B,S,D] hidden stream is half the HBM bytes.
        self.embedding = (jax.random.normal(k_emb, (vocab_size, d_model), jnp.float32)
                          * scale).astype(jnp.bfloat16)
        # Classification head parameters (stored as (in, out)).
        self.dense_w = jax.random.normal(k_dw, (d_model, d_model), jnp.float32) * scale
        self.dense_b = jax.random.normal(k_db, (d_model,), jnp.float32) * 0.01
        self.out_w = jax.random.normal(k_ow, (d_model, num_labels), jnp.float32) * scale
        self.out_b = jax.random.normal(k_ob, (num_labels,), jnp.float32) * 0.01

    def encoder(self, input_ids, attention_mask=None):
        # TODO(synk): stand-in for SwitchTransformersEncoderModel.last_hidden_state
        del attention_mask
        return self.embedding[input_ids]  # [B, S, D] bf16

    def forward(self, input_ids, attention_mask, labels=None, idx=None):
        hidden = self.encoder(input_ids, attention_mask)            # [B, S, D]
        logits = classification_head_pallas(
            hidden, self.dense_w, self.dense_b, self.out_w, self.out_b
        )                                                            # [B, num_labels]
        if labels is not None:
            # CrossEntropyLoss (mean reduction), plain-JAX glue.
            logp = jax.nn.log_softmax(logits, axis=-1)
            nll = -jnp.take_along_axis(logp, labels.reshape(-1, 1), axis=-1)
            loss = jnp.mean(nll)
            return {"loss": loss, "logits": logits, "idx": idx}
        return logits


# -----------------------------------------------------------------------------
# Pure-JAX reference (mirrors the kernel's bf16-operand / f32-accum numerics)
# -----------------------------------------------------------------------------
def _reference_logits(hidden, dense_w, dense_b, out_w, out_b):
    pooled = hidden.astype(jnp.float32).mean(axis=1)
    x = jnp.dot(pooled.astype(jnp.bfloat16), dense_w.astype(jnp.bfloat16),
                preferred_element_type=jnp.float32) + dense_b
    x = jnp.tanh(x)
    return jnp.dot(x.astype(jnp.bfloat16), out_w.astype(jnp.bfloat16),
                   preferred_element_type=jnp.float32) + out_b


if __name__ == "__main__":
    key = jax.random.PRNGKey(0)
    k_params, k_ids, k_lab = jax.random.split(key, 3)

    B, S, D = 2, 8, 32          # batch, seq, d_model
    num_labels = 2
    vocab = 64

    model = SwitchClassifierMultircPallas(num_labels, D, vocab, k_params)

    input_ids = jax.random.randint(k_ids, (B, S), 0, vocab, dtype=jnp.int32)
    attention_mask = jnp.ones((B, S), dtype=jnp.int32)
    labels = jax.random.randint(k_lab, (B,), 0, num_labels, dtype=jnp.int32)

    # logits-only path
    logits = model.forward(input_ids, attention_mask)
    logits = jax.block_until_ready(logits)

    # loss path
    out = model.forward(input_ids, attention_mask, labels=labels, idx=jnp.arange(B))
    loss = jax.block_until_ready(out["loss"])

    # verify against pure-JAX reference (same bf16-operand numerics)
    hidden = model.encoder(input_ids, attention_mask)
    ref = _reference_logits(hidden, model.dense_w, model.dense_b, model.out_w, model.out_b)
    assert np.allclose(np.asarray(logits), np.asarray(ref), atol=1e-2, rtol=1e-2), (
        "Pallas kernel output mismatch vs reference"
    )
    assert logits.shape == (B, num_labels)
    assert np.isfinite(float(loss))

    print("KERNEL_OK")
</pallas_src>

<mosaic_0001>
module attributes {stable_mosaic.version = 11 : i64} {
  func.func @_cls_head_kernel(%arg0: i32, %arg1: i32, %arg2: memref<2x8x32xbf16, #tpu.memory_space<vmem>>, %arg3: memref<32x32xbf16, #tpu.memory_space<vmem>>, %arg4: memref<1x32xf32, #tpu.memory_space<vmem>>, %arg5: memref<32x128xbf16, #tpu.memory_space<vmem>>, %arg6: memref<1x128xf32, #tpu.memory_space<vmem>>, %arg7: memref<2x128xf32, #tpu.memory_space<vmem>>, %arg8: memref<2x32xf32, #tpu.memory_space<vmem>>) attributes {dimension_semantics = [#tpu.dimension_semantics<parallel>, #tpu.dimension_semantics<arbitrary>], iteration_bounds = array<i64: 1, 1>, scalar_prefetch = 0 : i64, scratch_operands = 1 : i64, tpu.core_type = #tpu.core_type<tc>, window_params = [{transform_indices = @transform_0, window_bounds = array<i64: 2, 8, 32>}, {pipeline_mode = #tpu.pipeline_mode<synchronous>, transform_indices = @transform_1, window_bounds = array<i64: 32, 32>}, {pipeline_mode = #tpu.pipeline_mode<synchronous>, transform_indices = @transform_2, window_bounds = array<i64: 1, 32>}, {pipeline_mode = #tpu.pipeline_mode<synchronous>, transform_indices = @transform_3, window_bounds = array<i64: 32, 128>}, {pipeline_mode = #tpu.pipeline_mode<synchronous>, transform_indices = @transform_4, window_bounds = array<i64: 1, 128>}, {transform_indices = @transform_5, window_bounds = array<i64: 2, 128>}]} {
    %c0_i32 = arith.constant 0 : i32
    %0 = arith.cmpi eq, %arg1, %c0_i32 : i32
    %1 = arith.extui %0 : i1 to i32
    %c0_i32_0 = arith.constant 0 : i32
    %2 = arith.cmpi ne, %1, %c0_i32_0 : i32
    scf.if %2 {
      %cst_9 = arith.constant 0.000000e+00 : f32
      %12 = vector.broadcast %cst_9 : f32 to vector<2x32xf32>
      %c0_10 = arith.constant 0 : index
      %c0_11 = arith.constant 0 : index
      %13 = vector.load %arg8[%c0_10, %c0_11] : memref<2x32xf32, #tpu.memory_space<vmem>>, vector<2x32xf32>
      tpu.vector_store %arg8[%c0_10, %c0_11], %12 {strides = array<i32>} : memref<2x32xf32, #tpu.memory_space<vmem>>, vector<2x32xf32>,
    } else {
    }
    %c0 = arith.constant 0 : index
    %c0_1 = arith.constant 0 : index
    %c0_2 = arith.constant 0 : index
    %3 = vector.load %arg2[%c0, %c0_1, %c0_2] : memref<2x8x32xbf16, #tpu.memory_space<vmem>>, vector<2x8x32xbf16>
    %4 = arith.extf %3 : vector<2x8x32xbf16> to vector<2x8x32xf32>
    %c0_3 = arith.constant 0 : index
    %c0_4 = arith.constant 0 : index
    %5 = vector.load %arg8[%c0_3, %c0_4] : memref<2x32xf32, #tpu.memory_space<vmem>>, vector<2x32xf32>
    %cst = arith.constant dense<0.000000e+00> : vector<2x32xf32>
    %6 = vector.multi_reduction <add>, %4, %cst [1] : vector<2x8x32xf32> to vector<2x32xf32>
    %7 = arith.addf %5, %6 : vector<2x32xf32>
    %c0_5 = arith.constant 0 : index
    %c0_6 = arith.constant 0 : index
    %8 = vector.load %arg8[%c0_5, %c0_6] : memref<2x32xf32, #tpu.memory_space<vmem>>, vector<2x32xf32>
    tpu.vector_store %arg8[%c0_5, %c0_6], %7 {strides = array<i32>} : memref<2x32xf32, #tpu.memory_space<vmem>>, vector<2x32xf32>,
    %c0_i32_7 = arith.constant 0 : i32
    %9 = arith.cmpi eq, %arg1, %c0_i32_7 : i32
    %10 = arith.extui %9 : i1 to i32
    %c0_i32_8 = arith.constant 0 : i32
    %11 = arith.cmpi ne, %10, %c0_i32_8 : i32
    scf.if %11 {
      %c0_9 = arith.constant 0 : index
      %c0_10 = arith.constant 0 : index
      %12 = vector.load %arg8[%c0_9, %c0_10] : memref<2x32xf32, #tpu.memory_space<vmem>>, vector<2x32xf32>
      %cst_11 = arith.constant 1.250000e-01 : f32
      %13 = vector.broadcast %cst_11 : f32 to vector<2x32xf32>
      %14 = arith.mulf %12, %13 : vector<2x32xf32>
      %15 = arith.truncf %14 : vector<2x32xf32> to vector<2x32xbf16>
      %c0_12 = arith.constant 0 : index
      %c0_13 = arith.constant 0 : index
      %16 = vector.load %arg3[%c0_12, %c0_13] : memref<32x32xbf16, #tpu.memory_space<vmem>>, vector<32x32xbf16>
      %cst_14 = arith.constant dense<0.000000e+00> : vector<2x32xf32>
      %17 = tpu.matmul %15, %16, %cst_14 {dimension_numbers = #tpu.dot_dimension_numbers<[1], [0], [0], [1], [0, 0, 1, 1], [], []>} : vector<2x32xbf16>, vector<32x32xbf16>, vector<2x32xf32> -> vector<2x32xf32>
      %c0_15 = arith.constant 0 : index
      %c0_16 = arith.constant 0 : index
      %18 = vector.load %arg4[%c0_15, %c0_16] : memref<1x32xf32, #tpu.memory_space<vmem>>, vector<1x32xf32>
      %19 = vector.broadcast %18 : vector<1x32xf32> to vector<2x32xf32>
      %20 = arith.addf %17, %19 : vector<2x32xf32>
      %21 = math.tanh %20 : vector<2x32xf32>
      %22 = arith.truncf %21 : vector<2x32xf32> to vector<2x32xbf16>
      %c0_17 = arith.constant 0 : index
      %c0_18 = arith.constant 0 : index
      %23 = vector.load %arg5[%c0_17, %c0_18] : memref<32x128xbf16, #tpu.memory_space<vmem>>, vector<32x128xbf16>
      %cst_19 = arith.constant dense<0.000000e+00> : vector<2x128xf32>
      %24 = tpu.matmul %22, %23, %cst_19 {dimension_numbers = #tpu.dot_dimension_numbers<[1], [0], [0], [1], [0, 0, 1, 1], [], []>} : vector<2x32xbf16>, vector<32x128xbf16>, vector<2x128xf32> -> vector<2x128xf32>
      %c0_20 = arith.constant 0 : index
      %c0_21 = arith.constant 0 : index
      %25 = vector.load %arg6[%c0_20, %c0_21] : memref<1x128xf32, #tpu.memory_space<vmem>>, vector<1x128xf32>
      %26 = vector.broadcast %25 : vector<1x128xf32> to vector<2x128xf32>
      %27 = arith.addf %24, %26 : vector<2x128xf32>
      %c0_22 = arith.constant 0 : index
      %c0_23 = arith.constant 0 : index
      %28 = vector.load %arg7[%c0_22, %c0_23] : memref<2x128xf32, #tpu.memory_space<vmem>>, vector<2x128xf32>
      tpu.vector_store %arg7[%c0_22, %c0_23], %27 {strides = array<i32>} : memref<2x128xf32, #tpu.memory_space<vmem>>, vector<2x128xf32>,
    } else {
    }
    return
  }
  func.func @transform_0(%arg0: i32, %arg1: i32) -> (i32, i32, i32) {
    %c0_i32 = arith.constant 0 : i32
    %c0_i32_0 = arith.constant 0 : i32
    return %arg0, %arg1, %c0_i32 : i32, i32, i32
  }
  func.func @transform_1(%arg0: i32, %arg1: i32) -> (i32, i32) {
    %c0_i32 = arith.constant 0 : i32
    %c0_i32_0 = arith.constant 0 : i32
    %c0_i32_1 = arith.constant 0 : i32
    return %c0_i32, %c0_i32_0 : i32, i32
  }
  func.func @transform_2(%arg0: i32, %arg1: i32) -> (i32, i32) {
    %c0_i32 = arith.constant 0 : i32
    %c0_i32_0 = arith.constant 0 : i32
    %c0_i32_1 = arith.constant 0 : i32
    return %c0_i32, %c0_i32_0 : i32, i32
  }
  func.func @transform_3(%arg0: i32, %arg1: i32) -> (i32, i32) {
    %c0_i32 = arith.constant 0 : i32
    %c0_i32_0 = arith.constant 0 : i32
    %c0_i32_1 = arith.constant 0 : i32
    return %c0_i32, %c0_i32_0 : i32, i32
  }
  func.func @transform_4(%arg0: i32, %arg1: i32) -> (i32, i32) {
    %c0_i32 = arith.constant 0 : i32
    %c0_i32_0 = arith.constant 0 : i32
    %c0_i32_1 = arith.constant 0 : i32
    return %c0_i32, %c0_i32_0 : i32, i32
  }
  func.func @transform_5(%arg0: i32, %arg1: i32) -> (i32, i32) {
    %c0_i32 = arith.constant 0 : i32
    %c0_i32_0 = arith.constant 0 : i32
    return %arg0, %c0_i32 : i32, i32
  }
}

module attributes {stable_mosaic.version = 11 : i64} {
  func.func @_cls_head_kernel(%arg0: i32, %arg1: i32, %arg2: memref<2x8x32xbf16, #tpu.memory_space<vmem>>, %arg3: memref<32x32xbf16, #tpu.memory_space<vmem>>, %arg4: memref<1x32xf32, #tpu.memory_space<vmem>>, %arg5: memref<32x128xbf16, #tpu.memory_space<vmem>>, %arg6: memref<1x128xf32, #tpu.memory_space<vmem>>, %arg7: memref<2x128xf32, #tpu.memory_space<vmem>>, %arg8: memref<2x32xf32, #tpu.memory_space<vmem>>) attributes {dimension_semantics = [#tpu.dimension_semantics<parallel>, #tpu.dimension_semantics<arbitrary>], iteration_bounds = array<i64: 1, 1>, scalar_prefetch = 0 : i64, scratch_operands = 1 : i64, tpu.core_type = #tpu.core_type<tc>, window_params = [{transform_indices = @transform_0, window_bounds = array<i64: 2, 8, 32>}, {pipeline_mode = #tpu.pipeline_mode<synchronous>, transform_indices = @transform_1, window_bounds = array<i64: 32, 32>}, {pipeline_mode = #tpu.pipeline_mode<synchronous>, transform_indices = @transform_2, window_bounds = array<i64: 1, 32>}, {pipeline_mode = #tpu.pipeline_mode<synchronous>, transform_indices = @transform_3, window_bounds = array<i64: 32, 128>}, {pipeline_mode = #tpu.pipeline_mode<synchronous>, transform_indices = @transform_4, window_bounds = array<i64: 1, 128>}, {transform_indices = @transform_5, window_bounds = array<i64: 2, 128>}]} {
    %c0_i32 = arith.constant 0 : i32
    %0 = arith.cmpi eq, %arg1, %c0_i32 : i32
    %1 = arith.extui %0 : i1 to i32
    %c0_i32_0 = arith.constant 0 : i32
    %2 = arith.cmpi ne, %1, %c0_i32_0 : i32
    scf.if %2 {
      %cst_9 = arith.constant 0.000000e+00 : f32
      %12 = vector.broadcast %cst_9 : f32 to vector<2x32xf32>
      %c0_10 = arith.constant 0 : index
      %c0_11 = arith.constant 0 : index
      %13 = vector.load %arg8[%c0_10, %c0_11] : memref<2x32xf32, #tpu.memory_space<vmem>>, vector<2x32xf32>
      tpu.vector_store %arg8[%c0_10, %c0_11], %12 {strides = array<i32>} : memref<2x32xf32, #tpu.memory_space<vmem>>, vector<2x32xf32>,
    } else {
    }
    %c0 = arith.constant 0 : index
    %c0_1 = arith.constant 0 : index
    %c0_2 = arith.constant 0 : index
    %3 = vector.load %arg2[%c0, %c0_1, %c0_2] : memref<2x8x32xbf16, #tpu.memory_space<vmem>>, vector<2x8x32xbf16>
    %4 = arith.extf %3 : vector<2x8x32xbf16> to vector<2x8x32xf32>
    %c0_3 = arith.constant 0 : index
    %c0_4 = arith.constant 0 : index
    %5 = vector.load %arg8[%c0_3, %c0_4] : memref<2x32xf32, #tpu.memory_space<vmem>>, vector<2x32xf32>
    %cst = arith.constant dense<0.000000e+00> : vector<2x32xf32>
    %6 = vector.multi_reduction <add>, %4, %cst [1] : vector<2x8x32xf32> to vector<2x32xf32>
    %7 = arith.addf %5, %6 : vector<2x32xf32>
    %c0_5 = arith.constant 0 : index
    %c0_6 = arith.constant 0 : index
    %8 = vector.load %arg8[%c0_5, %c0_6] : memref<2x32xf32, #tpu.memory_space<vmem>>, vector<2x32xf32>
    tpu.vector_store %arg8[%c0_5, %c0_6], %7 {strides = array<i32>} : memref<2x32xf32, #tpu.memory_space<vmem>>, vector<2x32xf32>,
    %c0_i32_7 = arith.constant 0 : i32
    %9 = arith.cmpi eq, %arg1, %c0_i32_7 : i32
    %10 = arith.extui %9 : i1 to i32
    %c0_i32_8 = arith.constant 0 : i32
    %11 = arith.cmpi ne, %10, %c0_i32_8 : i32
    scf.if %11 {
      %c0_9 = arith.constant 0 : index
      %c0_10 = arith.constant 0 : index
      %12 = vector.load %arg8[%c0_9, %c0_10] : memref<2x32xf32, #tpu.memory_space<vmem>>, vector<2x32xf32>
      %cst_11 = arith.constant 1.250000e-01 : f32
      %13 = vector.broadcast %cst_11 : f32 to vector<2x32xf32>
      %14 = arith.mulf %12, %13 : vector<2x32xf32>
      %15 = arith.truncf %14 : vector<2x32xf32> to vector<2x32xbf16>
      %c0_12 = arith.constant 0 : index
      %c0_13 = arith.constant 0 : index
      %16 = vector.load %arg3[%c0_12, %c0_13] : memref<32x32xbf16, #tpu.memory_space<vmem>>, vector<32x32xbf16>
      %cst_14 = arith.constant dense<0.000000e+00> : vector<2x32xf32>
      %17 = tpu.matmul %15, %16, %cst_14 {dimension_numbers = #tpu.dot_dimension_numbers<[1], [0], [0], [1], [0, 0, 1, 1], [], []>} : vector<2x32xbf16>, vector<32x32xbf16>, vector<2x32xf32> -> vector<2x32xf32>
      %c0_15 = arith.constant 0 : index
      %c0_16 = arith.constant 0 : index
      %18 = vector.load %arg4[%c0_15, %c0_16] : memref<1x32xf32, #tpu.memory_space<vmem>>, vector<1x32xf32>
      %19 = vector.broadcast %18 : vector<1x32xf32> to vector<2x32xf32>
      %20 = arith.addf %17, %19 : vector<2x32xf32>
      %21 = math.tanh %20 : vector<2x32xf32>
      %22 = arith.truncf %21 : vector<2x32xf32> to vector<2x32xbf16>
      %c0_17 = arith.constant 0 : index
      %c0_18 = arith.constant 0 : index
      %23 = vector.load %arg5[%c0_17, %c0_18] : memref<32x128xbf16, #tpu.memory_space<vmem>>, vector<32x128xbf16>
      %cst_19 = arith.constant dense<0.000000e+00> : vector<2x128xf32>
      %24 = tpu.matmul %22, %23, %cst_19 {dimension_numbers = #tpu.dot_dimension_numbers<[1], [0], [0], [1], [0, 0, 1, 1], [], []>} : vector<2x32xbf16>, vector<32x128xbf16>, vector<2x128xf32> -> vector<2x128xf32>
      %c0_20 = arith.constant 0 : index
      %c0_21 = arith.constant 0 : index
      %25 = vector.load %arg6[%c0_20, %c0_21] : memref<1x128xf32, #tpu.memory_space<vmem>>, vector<1x128xf32>
      %26 = vector.broadcast %25 : vector<1x128xf32> to vector<2x128xf32>
      %27 = arith.addf %24, %26 : vector<2x128xf32>
      %c0_22 = arith.constant 0 : index
      %c0_23 = arith.constant 0 : index
      %28 = vector.load %arg7[%c0_22, %c0_23] : memref<2x128xf32, #tpu.memory_space<vmem>>, vector<2x128xf32>
      tpu.vector_store %arg7[%c0_22, %c0_23], %27 {strides = array<i32>} : memref<2x128xf32, #tpu.memory_space<vmem>>, vector<2x128xf32>,
    } else {
    }
    return
  }
  func.func @transform_0(%arg0: i32, %arg1: i32) -> (i32, i32, i32) {
    %c0_i32 = arith.constant 0 : i32
    %c0_i32_0 = arith.constant 0 : i32
    return %arg0, %arg1, %c0_i32 : i32, i32, i32
  }
  func.func @transform_1(%arg0: i32, %arg1: i32) -> (i32, i32) {
    %c0_i32 = arith.constant 0 : i32
    %c0_i32_0 = arith.constant 0 : i32
    %c0_i32_1 = arith.constant 0 : i32
    return %c0_i32, %c0_i32_0 : i32, i32
  }
  func.func @transform_2(%arg0: i32, %arg1: i32) -> (i32, i32) {
    %c0_i32 = arith.constant 0 : i32
    %c0_i32_0 = arith.constant 0 : i32
    %c0_i32_1 = arith.constant 0 : i32
    return %c0_i32, %c0_i32_0 : i32, i32
  }
  func.func @transform_3(%arg0: i32, %arg1: i32) -> (i32, i32) {
    %c0_i32 = arith.constant 0 : i32
    %c0_i32_0 = arith.constant 0 : i32
    %c0_i32_1 = arith.constant 0 : i32
    return %c0_i32, %c0_i32_0 : i32, i32
  }
  func.func @transform_4(%arg0: i32, %arg1: i32) -> (i32, i32) {
    %c0_i32 = arith.constant 0 : i32
    %c0_i32_0 = arith.constant 0 : i32
    %c0_i32_1 = arith.constant 0 : i32
    return %c0_i32, %c0_i32_0 : i32, i32
  }
  func.func @transform_5(%arg0: i32, %arg1: i32) -> (i32, i32) {
    %c0_i32 = arith.constant 0 : i32
    %c0_i32_0 = arith.constant 0 : i32
    return %arg0, %c0_i32 : i32, i32
  }
}

</mosaic_0001>

<bundles_post_ra>
// kernel: tpu_custom_call.1
= control target key start
LH: loop header
LB: loop body
LE: loop exit
PB: predicated region body
PF: predicated region fallthrough
CT: control target
= control target key end

     0   :  { %10 = vsyncpa [#allocation4], 0  ;;  %s450_s0 = inlined_call_operand.hbm [shape: bf16[2,8,32], index: 0, kind: input, shape index: {}]   ;;  %s451_s1 = inlined_call_operand.hbm [shape: bf16[32,32], index: 1, kind: input, shape index: {}]   ;;  %s452_s2 = inlined_call_operand.vmem [shape: f32[1,32], index: 2, kind: input, shape index: {}]   ;;  %s453_s3 = inlined_call_operand.hbm [shape: bf16[32,128], index: 3, kind: input, shape index: {}]   ;;  %s454_s4 = inlined_call_operand.vmem [shape: f32[1,128], index: 4, kind: input, shape index: {}]   ;;  %s455_s5 = inlined_call_operand.hbm [shape: f32[2,128], index: 5, kind: output, shape index: {}]  }
   0x1   :  { %11 = vsyncpa [#allocation7], 0 }
   0x2   :  { %12 = vsyncpa [#allocation5], 0  ;;  %s388_s18 = smov [#allocation6]   ;;  %s389_s20 = smov [#allocation3]  }
   0x3   :  { %s30_s19 = sshll.u32 %s388_s18, 4  ;;  %s18_s21 = sshll.u32 %s389_s20, 4  ;;  %s31_s19 = int_to_ptr.vmem [resolvable:$true] %s30_s19  ;;  %s19_s21 = int_to_ptr.vmem [resolvable:$true] %s18_s21 }
   0x4   :  { %s310_s22 = scalar_lea.vmem %s31_s19, 256  ;;  %p315_p1 = scmp.lt.s32.totalorder %s31_s19, %s31_s19 }
   0x5   :  { %p311_p0 = scmp.ne.s32.totalorder %s31_s19, %s310_s22  ;;  %p316_p2 = scmp.lt.s32.totalorder %s310_s22, %s310_s22 }
   0x7   :  { %p317_p3 = por %p316_p2, %p315_p1 }
   0x9   :  { %p318_p4 = pnand %p317_p3, %p311_p0 }
   0xb   :  { %321 = shalt.err (!%p318_p4)
}
   0xc   :  { %s390_s23 = smov 64   ;;  %s391_s24 = smov 4  }
   0xd   :  { %36 = dma.hbm_to_vmem [thread:$0]  %s451_s1, 256, %s31_s19, [#allocation7], %s390_s23, %s390_s23, %s391_s24  }
   0xe   :  { %s330_s27 = scalar_lea.vmem %s19_s21, 128  ;;  %p335_p6 = scmp.lt.s32.totalorder %s19_s21, %s19_s21 }
   0xf   :  { %p331_p5 = scmp.ne.s32.totalorder %s19_s21, %s330_s27  ;;  %p336_p7 = scmp.lt.s32.totalorder %s330_s27, %s330_s27 }
  0x11   :  { %p337_p8 = por %p336_p7, %p335_p6 }
  0x13   :  { %p338_p9 = pnand %p337_p8, %p331_p5 }
  0x15   :  { %341 = shalt.err (!%p338_p9)
}
  0x16   :  { %24 = dma.hbm_to_vmem [thread:$0]  %s450_s0, 128, %s19_s21, [#allocation4], %s390_s23, %s390_s23, %s391_s24  }
  0x17   :  { %s392_s30 = smov [#allocation8]  }
  0x18   :  { %s44_s6 = sshll.u32 %s392_s30, 4  ;;  %s45_s6 = int_to_ptr.vmem [resolvable:$true] %s44_s6 }
  0x19   :  { %s350_s7 = scalar_lea.vmem %s45_s6, 256  ;;  %p355_p11 = scmp.lt.s32.totalorder %s45_s6, %s45_s6 }
  0x1a   :  { %p351_p10 = scmp.ne.s32.totalorder %s45_s6, %s350_s7  ;;  %p356_p12 = scmp.lt.s32.totalorder %s350_s7, %s350_s7 }
  0x1c   :  { %p357_p13 = por %p356_p12, %p355_p11 }
  0x1e   :  { %p358_p0 = pnand %p357_p13, %p351_p10 }
  0x20   :  { %361 = shalt.err (!%p358_p0)
}
  0x21   :  { %50 = dma.hbm_to_vmem [thread:$0]  %s453_s3, 256, %s45_s6, [#allocation7], %s390_s23, %s390_s23, %s391_s24  }
  0x22   :  { %382 = dma.done.wait [#allocation4], 128  }
  0x23   :  { %383 = vsyncadd [#allocation4], 4294967168 }
  0x24   :  { %384 = dma.done.wait [#allocation7], 512  }
  0x25   :  { %385 = vsyncadd [#allocation7], 4294966784  ;;  %vm67_vm0 = vcmask 254976   ;;  %v393_v0 = vmov 0.0   ;;  %vm394_vm1 = vmmov 0   ;;  %v296_v1 = vld [vmem:[#allocation6 + $0x8] sm:$0xff]  }
  0x26   :  { %68 = vst.msk [vmem:[#allocation2] sm:$0x3] %vm67_vm0, %v393_v0  ;;  %272 = vmatprep.subr.bf16.mxu0 %v393_v0  ;;  %276 = vmatprep.mubr.msk.bf16.mxu0 %vm394_vm1, %v393_v0  ;;  %v297_v2 = vld [vmem:[#allocation6] sm:$0xff]   ;;  %v263_v3 = vld [vmem:[#allocation3] sm:$0xff]   ;;  %vm74_vm2 = vcmask 261120   ;;  %vm91_vm3 = vcmask 1041409  }
  0x27   :  { %280 = vmatprep.subr.bf16.mxu1 %v393_v0  ;;  %284 = vmatprep.mubr.msk.bf16.mxu1 %vm394_vm1, %v393_v0  ;;  %v264_v4 = vunpack.c.l.bf16 %v263_v3  ;;  %v265_v5 = vunpack.c.h.bf16 %v263_v3  ;;  %v298_v26 = vld [vmem:[#allocation8 + $0x8] sm:$0xff]   ;;  %v299_v27 = vld [vmem:[#allocation8] sm:$0xff]   ;;  %s395_s11 = smov [#allocation9]  }
  0x28   :  { %273 = vmatpush3.bf16.msra.mxu0 %v296_v1  ;;  %281 = vmatpush3.bf16.msra.mxu1 %v298_v26  ;;  %v254_v28 = vld [vmem:[%s452_s2] ss:$0 sm:$0xff]  ;;  %s244_s12 = sshll.u32 %s395_s11, 4  ;;  %s245_s12 = int_to_ptr.vmem [resolvable:$true] %s244_s12 }
  0x29   :  { %274 = vmatprep.subr.bf16.mxu0 %v393_v0  ;;  %v75_v6 = vsel %vm74_vm2, %v264_v4, 0.0  ;;  %v82_v7 = vsel %vm74_vm2, %v265_v5, 0.0  ;;  %282 = vmatprep.subr.bf16.mxu1 %v393_v0  ;;  %v258_v36 = vld [vmem:[%s454_s4] ss:$0 sm:$0xff]  ;;  %s362_s2 = scalar_lea.vmem %s245_s12, 32  ;;  %p367_p2 = scmp.lt.s32.totalorder %s245_s12, %s245_s12 }
  0x2a   :  { %v76_v8 = vrot.slane %v75_v6, 4  ;;  %v83_v9 = vrot.slane %v82_v7, 4  ;;  %p363_p1 = scmp.ne.s32.totalorder %s245_s12, %s362_s2  ;;  %p368_p3 = scmp.lt.s32.totalorder %s362_s2, %s362_s2 }
  0x2c   :  { %275 = vmatpush3.bf16.msra.mxu0 %v297_v2  ;;  %v77_v10 = vadd.f32 %v76_v8, %v75_v6  ;;  %v84_v11 = vadd.f32 %v83_v9, %v82_v7  ;;  %283 = vmatpush3.bf16.msra.mxu1 %v299_v27  ;;  %p369_p4 = por %p368_p3, %p367_p2 }
  0x2d   :  { %v73_v18 = vld [vmem:[#allocation2] sm:$0x3] }
  0x2e   :  { %v78_v12 = vrot.slane %v77_v10, 2  ;;  %v85_v13 = vrot.slane %v84_v11, 2  ;;  %p370_p5 = pnand %p369_p4, %p363_p1 }
  0x30   :  { %v79_v14 = vadd.f32 %v78_v12, %v77_v10  ;;  %v86_v15 = vadd.f32 %v85_v13, %v84_v11 }
  0x32   :  { %v80_v16 = vrot.slane %v79_v14, 1  ;;  %v87_v17 = vrot.slane %v86_v15, 1 }
  0x34   :  { %v81_v19 = vadd.f32 %v80_v16, %v79_v14  ;;  %v88_v20 = vadd.f32 %v87_v17, %v86_v15 }
  0x36   :  { %v92_v21 = vsel %vm91_vm3, %v88_v20, %v81_v19 }
  0x37   :  { %v94_v22 = vadd.f32 %v92_v21, %v73_v18 }
  0x39   :  { %96 = vst.msk [vmem:[#allocation2] sm:$0x3] %vm67_vm0, %v94_v22 }
  0x40   :  { %v100_v23 = vld [vmem:[#allocation2] sm:$0x3] }
  0x41   :  { %v101_v24 = vmul.f32 0.125, %v100_v23 }
  0x43   :  { %v102_v25 = vpack.c.bf16 %v101_v24, %v101_v24 }
  0x45   :  { %277 = vmatmul.mubr.msk.bf16.vlgmr.msra.gmra.mxu0 %vm74_vm2, %v102_v25 }
 0x105   :  { %v163_v29 = vpop.f32.mrf.mxu0 }
 0x106   :  { %v164_v30 = vadd.f32 %v254_v28, %v163_v29 }
 0x107   :  { %v278_v31 = vpop.f32.mrf.mxu0 }
 0x108   :  { %300 = vtanh.f32 %v164_v30 }
 0x109   :  { %v166_v32 = vpop.f32.mrf.mxu0 }
 0x10b   :  { %v279_v33 = vpop.f32.mrf.mxu0 }
 0x115   :  { %v301_v34 = vpop.eup %300 }
 0x116   :  { %v170_v35 = vpack.c.bf16 %v301_v34, %v301_v34 }
 0x118   :  { %285 = vmatmul.mubr.msk.bf16.vlgmr.msra.gmra.mxu1 %vm74_vm2, %v170_v35 }
 0x1d8   :  { %v231_v37 = vpop.f32.mrf.mxu1 }
 0x1d9   :  { %v232_v38 = vadd.f32 %v258_v36, %v231_v37 }
 0x1da   :  { %v286_v39 = vpop.f32.mrf.mxu1 }
 0x1db   :  { %237 = vst [vmem:[#allocation9] sm:$0x3] %v232_v38 }
 0x1dc   :  { %v234_v40 = vpop.f32.mrf.mxu1 }
 0x1dd   :  { %373 = shalt.err (!%p370_p5)
}
 0x1de   :  { %247 = dma.vmem_to_hbm [thread:$0]  %s245_s12, 32, %s455_s5, [#allocation5]   ;;  %v287_v41 = vpop.f32.mrf.mxu1 }
 0x1df   :  { %386 = dma.done.wait [#allocation5], 32  }
 0x1e0   :  { %387 = vsyncadd [#allocation5], 4294967264 }
 0x1e1   :  { %251 = vsyncpa [#allocation4], 1 }
 0x1e2   :  { %252 = vsyncpa [#allocation7], 1 }
 0x1e3   :  { %253 = vsyncpa [#allocation5], 1 }

// kernel: tpu_custom_call.1
= control target key start
LH: loop header
LB: loop body
LE: loop exit
PB: predicated region body
PF: predicated region fallthrough
CT: control target
= control target key end

     0   :  { %10 = vsyncpa [#allocation4], 0  ;;  %s450_s0 = inlined_call_operand.hbm [shape: bf16[2,8,32], index: 0, kind: input, shape index: {}]   ;;  %s451_s1 = inlined_call_operand.hbm [shape: bf16[32,32], index: 1, kind: input, shape index: {}]   ;;  %s452_s2 = inlined_call_operand.vmem [shape: f32[1,32], index: 2, kind: input, shape index: {}]   ;;  %s453_s3 = inlined_call_operand.hbm [shape: bf16[32,128], index: 3, kind: input, shape index: {}]   ;;  %s454_s4 = inlined_call_operand.vmem [shape: f32[1,128], index: 4, kind: input, shape index: {}]   ;;  %s455_s5 = inlined_call_operand.hbm [shape: f32[2,128], index: 5, kind: output, shape index: {}]  }
   0x1   :  { %11 = vsyncpa [#allocation7], 0 }
   0x2   :  { %12 = vsyncpa [#allocation5], 0  ;;  %s388_s18 = smov [#allocation6]   ;;  %s389_s20 = smov [#allocation3]  }
   0x3   :  { %s30_s19 = sshll.u32 %s388_s18, 4  ;;  %s18_s21 = sshll.u32 %s389_s20, 4  ;;  %s31_s19 = int_to_ptr.vmem [resolvable:$true] %s30_s19  ;;  %s19_s21 = int_to_ptr.vmem [resolvable:$true] %s18_s21 }
   0x4   :  { %s310_s22 = scalar_lea.vmem %s31_s19, 256  ;;  %p315_p1 = scmp.lt.s32.totalorder %s31_s19, %s31_s19 }
   0x5   :  { %p311_p0 = scmp.ne.s32.totalorder %s31_s19, %s310_s22  ;;  %p316_p2 = scmp.lt.s32.totalorder %s310_s22, %s310_s22 }
   0x7   :  { %p317_p3 = por %p316_p2, %p315_p1 }
   0x9   :  { %p318_p4 = pnand %p317_p3, %p311_p0 }
   0xb   :  { %321 = shalt.err (!%p318_p4)
}
   0xc   :  { %s390_s23 = smov 64   ;;  %s391_s24 = smov 4  }
   0xd   :  { %36 = dma.hbm_to_vmem [thread:$0]  %s451_s1, 256, %s31_s19, [#allocation7], %s390_s23, %s390_s23, %s391_s24  }
   0xe   :  { %s330_s27 = scalar_lea.vmem %s19_s21, 128  ;;  %p335_p6 = scmp.lt.s32.totalorder %s19_s21, %s19_s21 }
   0xf   :  { %p331_p5 = scmp.ne.s32.totalorder %s19_s21, %s330_s27  ;;  %p336_p7 = scmp.lt.s32.totalorder %s330_s27, %s330_s27 }
  0x11   :  { %p337_p8 = por %p336_p7, %p335_p6 }
  0x13   :  { %p338_p9 = pnand %p337_p8, %p331_p5 }
  0x15   :  { %341 = shalt.err (!%p338_p9)
}
  0x16   :  { %24 = dma.hbm_to_vmem [thread:$0]  %s450_s0, 128, %s19_s21, [#allocation4], %s390_s23, %s390_s23, %s391_s24  }
  0x17   :  { %s392_s30 = smov [#allocation8]  }
  0x18   :  { %s44_s6 = sshll.u32 %s392_s30, 4  ;;  %s45_s6 = int_to_ptr.vmem [resolvable:$true] %s44_s6 }
  0x19   :  { %s350_s7 = scalar_lea.vmem %s45_s6, 256  ;;  %p355_p11 = scmp.lt.s32.totalorder %s45_s6, %s45_s6 }
  0x1a   :  { %p351_p10 = scmp.ne.s32.totalorder %s45_s6, %s350_s7  ;;  %p356_p12 = scmp.lt.s32.totalorder %s350_s7, %s350_s7 }
  0x1c   :  { %p357_p13 = por %p356_p12, %p355_p11 }
  0x1e   :  { %p358_p0 = pnand %p357_p13, %p351_p10 }
  0x20   :  { %361 = shalt.err (!%p358_p0)
}
  0x21   :  { %50 = dma.hbm_to_vmem [thread:$0]  %s453_s3, 256, %s45_s6, [#allocation7], %s390_s23, %s390_s23, %s391_s24  }
  0x22   :  { %382 = dma.done.wait [#allocation4], 128  }
  0x23   :  { %383 = vsyncadd [#allocation4], 4294967168 }
  0x24   :  { %384 = dma.done.wait [#allocation7], 512  }
  0x25   :  { %385 = vsyncadd [#allocation7], 4294966784  ;;  %vm67_vm0 = vcmask 254976   ;;  %v393_v0 = vmov 0.0   ;;  %vm394_vm1 = vmmov 0   ;;  %v296_v1 = vld [vmem:[#allocation6 + $0x8] sm:$0xff]  }
  0x26   :  { %68 = vst.msk [vmem:[#allocation2] sm:$0x3] %vm67_vm0, %v393_v0  ;;  %272 = vmatprep.subr.bf16.mxu0 %v393_v0  ;;  %276 = vmatprep.mubr.msk.bf16.mxu0 %vm394_vm1, %v393_v0  ;;  %v297_v2 = vld [vmem:[#allocation6] sm:$0xff]   ;;  %v263_v3 = vld [vmem:[#allocation3] sm:$0xff]   ;;  %vm74_vm2 = vcmask 261120   ;;  %vm91_vm3 = vcmask 1041409  }
  0x27   :  { %280 = vmatprep.subr.bf16.mxu1 %v393_v0  ;;  %284 = vmatprep.mubr.msk.bf16.mxu1 %vm394_vm1, %v393_v0  ;;  %v264_v4 = vunpack.c.l.bf16 %v263_v3  ;;  %v265_v5 = vunpack.c.h.bf16 %v263_v3  ;;  %v298_v26 = vld [vmem:[#allocation8 + $0x8] sm:$0xff]   ;;  %v299_v27 = vld [vmem:[#allocation8] sm:$0xff]   ;;  %s395_s11 = smov [#allocation9]  }
  0x28   :  { %273 = vmatpush3.bf16.msra.mxu0 %v296_v1  ;;  %281 = vmatpush3.bf16.msra.mxu1 %v298_v26  ;;  %v254_v28 = vld [vmem:[%s452_s2] ss:$0 sm:$0xff]  ;;  %s244_s12 = sshll.u32 %s395_s11, 4  ;;  %s245_s12 = int_to_ptr.vmem [resolvable:$true] %s244_s12 }
  0x29   :  { %274 = vmatprep.subr.bf16.mxu0 %v393_v0  ;;  %v75_v6 = vsel %vm74_vm2, %v264_v4, 0.0  ;;  %v82_v7 = vsel %vm74_vm2, %v265_v5, 0.0  ;;  %282 = vmatprep.subr.bf16.mxu1 %v393_v0  ;;  %v258_v36 = vld [vmem:[%s454_s4] ss:$0 sm:$0xff]  ;;  %s362_s2 = scalar_lea.vmem %s245_s12, 32  ;;  %p367_p2 = scmp.lt.s32.totalorder %s245_s12, %s245_s12 }
  0x2a   :  { %v76_v8 = vrot.slane %v75_v6, 4  ;;  %v83_v9 = vrot.slane %v82_v7, 4  ;;  %p363_p1 = scmp.ne.s32.totalorder %s245_s12, %s362_s2  ;;  %p368_p3 = scmp.lt.s32.totalorder %s362_s2, %s362_s2 }
  0x2c   :  { %275 = vmatpush3.bf16.msra.mxu0 %v297_v2  ;;  %v77_v10 = vadd.f32 %v76_v8, %v75_v6  ;;  %v84_v11 = vadd.f32 %v83_v9, %v82_v7  ;;  %283 = vmatpush3.bf16.msra.mxu1 %v299_v27  ;;  %p369_p4 = por %p368_p3, %p367_p2 }
  0x2d   :  { %v73_v18 = vld [vmem:[#allocation2] sm:$0x3] }
  0x2e   :  { %v78_v12 = vrot.slane %v77_v10, 2  ;;  %v85_v13 = vrot.slane %v84_v11, 2  ;;  %p370_p5 = pnand %p369_p4, %p363_p1 }
  0x30   :  { %v79_v14 = vadd.f32 %v78_v12, %v77_v10  ;;  %v86_v15 = vadd.f32 %v85_v13, %v84_v11 }
  0x32   :  { %v80_v16 = vrot.slane %v79_v14, 1  ;;  %v87_v17 = vrot.slane %v86_v15, 1 }
  0x34   :  { %v81_v19 = vadd.f32 %v80_v16, %v79_v14  ;;  %v88_v20 = vadd.f32 %v87_v17, %v86_v15 }
  0x36   :  { %v92_v21 = vsel %vm91_vm3, %v88_v20, %v81_v19 }
  0x37   :  { %v94_v22 = vadd.f32 %v92_v21, %v73_v18 }
  0x39   :  { %96 = vst.msk [vmem:[#allocation2] sm:$0x3] %vm67_vm0, %v94_v22 }
  0x40   :  { %v100_v23 = vld [vmem:[#allocation2] sm:$0x3] }
  0x41   :  { %v101_v24 = vmul.f32 0.125, %v100_v23 }
  0x43   :  { %v102_v25 = vpack.c.bf16 %v101_v24, %v101_v24 }
  0x45   :  { %277 = vmatmul.mubr.msk.bf16.vlgmr.msra.gmra.mxu0 %vm74_vm2, %v102_v25 }
 0x105   :  { %v163_v29 = vpop.f32.mrf.mxu0 }
 0x106   :  { %v164_v30 = vadd.f32 %v254_v28, %v163_v29 }
 0x107   :  { %v278_v31 = vpop.f32.mrf.mxu0 }
 0x108   :  { %300 = vtanh.f32 %v164_v30 }
 0x109   :  { %v166_v32 = vpop.f32.mrf.mxu0 }
 0x10b   :  { %v279_v33 = vpop.f32.mrf.mxu0 }
 0x115   :  { %v301_v34 = vpop.eup %300 }
 0x116   :  { %v170_v35 = vpack.c.bf16 %v301_v34, %v301_v34 }
 0x118   :  { %285 = vmatmul.mubr.msk.bf16.vlgmr.msra.gmra.mxu1 %vm74_vm2, %v170_v35 }
 0x1d8   :  { %v231_v37 = vpop.f32.mrf.mxu1 }
 0x1d9   :  { %v232_v38 = vadd.f32 %v258_v36, %v231_v37 }
 0x1da   :  { %v286_v39 = vpop.f32.mrf.mxu1 }
 0x1db   :  { %237 = vst [vmem:[#allocation9] sm:$0x3] %v232_v38 }
 0x1dc   :  { %v234_v40 = vpop.f32.mrf.mxu1 }
 0x1dd   :  { %373 = shalt.err (!%p370_p5)
}
 0x1de   :  { %247 = dma.vmem_to_hbm [thread:$0]  %s245_s12, 32, %s455_s5, [#allocation5]   ;;  %v287_v41 = vpop.f32.mrf.mxu1 }
 0x1df   :  { %386 = dma.done.wait [#allocation5], 32  }
 0x1e0   :  { %387 = vsyncadd [#allocation5], 4294967264 }
 0x1e1   :  { %251 = vsyncpa [#allocation4], 1 }
 0x1e2   :  { %252 = vsyncpa [#allocation7], 1 }
 0x1e3   :  { %253 = vsyncpa [#allocation5], 1 }

</bundles_post_ra>
